<compile_context>
chip_gen: v7x
topology: tpu7x:2x2x1
jax: 0.10.0
libtpu: 0.0.40
codegen_flags: <defaults>
</compile_context>

<pallas_src>
import functools

import jax
import jax.numpy as jnp
from jax.experimental import pallas as pl
from jax.experimental.pallas import tpu as pltpu


# ---------------------------------------------------------------------------
# Fully fused forward kernel
# ---------------------------------------------------------------------------
def _fused_down_kernel(H, W, Cin, Cout, n_layers, residual, pooling, *refs):
    """conv1 + residual conv blocks + optional 2x2 max-pool, fully fused.

    refs = (x, w[0..L-1], shift[0..L-1], out_before, [out_pool],
            pad0, pad1, [pool_buf])
    Activation layout inside the kernel: (H, W*C)  (lanes = W*C).
    """
    idx = 0
    x_ref = refs[idx]; idx += 1
    w_refs = refs[idx:idx + n_layers]; idx += n_layers
    s_refs = refs[idx:idx + n_layers]; idx += n_layers
    o_before = refs[idx]; idx += 1
    o_pool = None
    if pooling:
        o_pool = refs[idx]; idx += 1
    pad0 = refs[idx]
    pad1 = refs[idx + 1]
    pool_buf = refs[idx + 2] if pooling else None

    lc_in = W * Cin
    lc = W * Cout

    # ---- 1-row zero halo kept in VMEM (no host-side jnp.pad) ----
    pad0[0:1, :] = jnp.zeros((1, lc_in), pad0.dtype)
    pad0[H + 1:H + 2, :] = jnp.zeros((1, lc_in), pad0.dtype)
    pad0[1:H + 1, :] = x_ref[0].astype(pad0.dtype)
    pad1[0:1, :] = jnp.zeros((1, lc), pad1.dtype)
    pad1[H + 1:H + 2, :] = jnp.zeros((1, lc), pad1.dtype)

    y = None
    for l in range(n_layers):
        src = pad0 if l == 0 else pad1
        w_ref = w_refs[l]
        # 3x3 conv == 3 sublane-shifted matmuls (kw taps folded into K).
        acc = jnp.dot(src[0:H, :].astype(jnp.bfloat16), w_ref[0],
                      preferred_element_type=jnp.float32)
        for kh in (1, 2):
            acc = acc + jnp.dot(src[kh:kh + H, :].astype(jnp.bfloat16),
                                w_ref[kh], preferred_element_type=jnp.float32)
        acc = acc + s_refs[l][...]                # folded conv-bias + BN shift
        if residual and l > 0:
            acc = acc + pad1[1:H + 1, :]          # residual straight from VMEM
        y = jnp.maximum(acc, 0.0)                 # ReLU
        if (l + 1 < n_layers) or pooling:
            pad1[1:H + 1, :] = y                  # stays resident for next layer / pool

    o_before[0] = y.astype(o_before.dtype)        # lane-dense (H, W*Cout) store

    if pooling:
        hh, wh = H // 2, W // 2
        # H-direction pool: strided sublane reads of the VMEM-resident activation.
        rows_even = pad1[pl.ds(1, hh, stride=2), :]   # y rows 0,2,4,...
        rows_odd = pad1[pl.ds(2, hh, stride=2), :]    # y rows 1,3,5,...
        pool_buf[...] = jnp.maximum(rows_even, rows_odd)
        # W-direction pool: adjacent Cout-wide lane groups.
        for wo in range(wh):
            a = pool_buf[:, (2 * wo) * Cout:(2 * wo + 1) * Cout]
            b = pool_buf[:, (2 * wo + 1) * Cout:(2 * wo + 2) * Cout]
            o_pool[0, :, wo * Cout:(wo + 1) * Cout] = jnp.maximum(a, b)


# ---------------------------------------------------------------------------
# Host-side parameter prep
# ---------------------------------------------------------------------------
def _fold_bn(conv_bias, gamma, beta, mean, var, eps=1e-5):
    scale = gamma / jnp.sqrt(var + eps)
    shift = (conv_bias - mean) * scale + beta
    return scale, shift


def _band_weights(w_hwio, W):
    """(3,3,Cin,Cout) conv weights -> (3, W*Cin, W*Cout) banded matrices so the
    kw taps and the W-direction zero padding live in the contraction dim."""
    _, _, cin, cout = w_hwio.shape
    b = jnp.zeros((3, W * cin, W * cout), w_hwio.dtype)
    for kw in range(3):
        for wo in range(W):
            wi = wo + kw - 1
            if 0 <= wi < W:
                b = b.at[:, wi * cin:(wi + 1) * cin,
                         wo * cout:(wo + 1) * cout].set(w_hwio[:, kw])
    return b


def init_params(key, in_c, out_c, blocks):
    keys = iter(jax.random.split(key, 64))

    def w_init(shape, fan_in):
        bound = 1.0 / float(fan_in) ** 0.5
        return jax.random.uniform(next(keys), shape, jnp.float32, -bound, bound)

    def bn_init(c):
        gamma = 1.0 + 0.1 * jax.random.normal(next(keys), (c,), jnp.float32)
        beta = 0.1 * jax.random.normal(next(keys), (c,), jnp.float32)
        mean = 0.1 * jax.random.normal(next(keys), (c,), jnp.float32)
        var = jnp.abs(1.0 + 0.1 * jax.random.normal(next(keys), (c,), jnp.float32))
        return (gamma, beta, mean, var)

    return {
        "conv1_w": w_init((3, 3, in_c, out_c), 9 * in_c),       # HWIO
        "conv1_b": w_init((out_c,), 9 * in_c),
        "norm1": bn_init(out_c),
        "conv2_w": [w_init((3, 3, out_c, out_c), 9 * out_c) for _ in range(blocks)],
        "conv2_b": [w_init((out_c,), 9 * out_c) for _ in range(blocks)],
        "bn": [bn_init(out_c) for _ in range(blocks)],
    }


# ---------------------------------------------------------------------------
# Module forward (mirrors DownCoXvD.forward)
# ---------------------------------------------------------------------------
def down_coxvd_forward(params, x_nchw, blocks,
                       pooling=True, residual=True, batch_norm=True):
    """Returns (x2, before_pool), both NCHW, like the PyTorch module."""
    N, Cin, H, W = x_nchw.shape
    Cout = params["conv1_w"].shape[-1]
    n_layers = blocks + 1
    Hh, Wh = H // 2, W // 2

    # NCHW -> NHWC -> (N, H, W*Cin), bf16 on the HBM side.
    x = jnp.transpose(x_nchw, (0, 2, 3, 1)).astype(jnp.float32)
    x2d = x.reshape(N, H, W * Cin).astype(jnp.bfloat16)

    # Fold conv bias + BN into (scale, shift); fold scale into the weights;
    # build banded weight matrices and per-lane shift rows.
    w_list, s_list = [], []
    s1, b1 = _fold_bn(params["conv1_b"], *params["norm1"])
    w_list.append(_band_weights(params["conv1_w"] * s1, W).astype(jnp.bfloat16))
    s_list.append(jnp.tile(b1, W).reshape(1, W * Cout).astype(jnp.float32))
    for i in range(blocks):
        if batch_norm:
            s, b = _fold_bn(params["conv2_b"][i], *params["bn"][i])
        else:
            s = jnp.ones((Cout,), jnp.float32)
            b = params["conv2_b"][i]
        w_list.append(_band_weights(params["conv2_w"][i] * s, W).astype(jnp.bfloat16))
        s_list.append(jnp.tile(b, W).reshape(1, W * Cout).astype(jnp.float32))

    kernel = functools.partial(_fused_down_kernel, H, W, Cin, Cout,
                               n_layers, residual, pooling)

    in_specs = [pl.BlockSpec((1, H, W * Cin), lambda n: (n, 0, 0))]
    for l in range(n_layers):
        k_l = W * (Cin if l == 0 else Cout)
        in_specs.append(pl.BlockSpec((3, k_l, W * Cout), lambda n: (0, 0, 0)))
    for _ in range(n_layers):
        in_specs.append(pl.BlockSpec((1, W * Cout), lambda n: (0, 0)))

    out_shape = [jax.ShapeDtypeStruct((N, H, W * Cout), jnp.float32)]
    out_specs = [pl.BlockSpec((1, H, W * Cout), lambda n: (n, 0, 0))]
    if pooling:
        out_shape.append(jax.ShapeDtypeStruct((N, Hh, Wh * Cout), jnp.float32))
        out_specs.append(pl.BlockSpec((1, Hh, Wh * Cout), lambda n: (n, 0, 0)))

    scratch_shapes = [pltpu.VMEM((H + 2, W * Cin), jnp.float32),    # padded x
                      pltpu.VMEM((H + 2, W * Cout), jnp.float32)]   # padded act
    if pooling:
        scratch_shapes.append(pltpu.VMEM((Hh, W * Cout), jnp.float32))

    outs = pl.pallas_call(
        kernel,
        out_shape=tuple(out_shape),
        grid=(N,),
        in_specs=in_specs,
        out_specs=tuple(out_specs),
        scratch_shapes=scratch_shapes,
        compiler_params=pltpu.CompilerParams(
            dimension_semantics=("parallel",),      # batch images across cores
            vmem_limit_bytes=32 * 1024 * 1024),
    )(x2d, *w_list, *s_list)

    before_nchw = jnp.transpose(outs[0].reshape(N, H, W, Cout), (0, 3, 1, 2))
    if pooling:
        pooled_nchw = jnp.transpose(outs[1].reshape(N, Hh, Wh, Cout), (0, 3, 1, 2))
        return pooled_nchw, before_nchw
    return before_nchw, before_nchw


# ---------------------------------------------------------------------------
# Pure-JAX reference (sanity check)
# ---------------------------------------------------------------------------
def _ref_forward(params, x_nchw, blocks, pooling=True, residual=True):
    x = jnp.transpose(x_nchw, (0, 2, 3, 1)).astype(jnp.float32)

    def conv(x, w, scale, shift):
        y = jax.lax.conv_general_dilated(
            x, w, window_strides=(1, 1), padding="SAME",
            dimension_numbers=("NHWC", "HWIO", "NHWC"))
        return y * scale + shift

    s1, b1 = _fold_bn(params["conv1_b"], *params["norm1"])
    x1 = jax.nn.relu(conv(x, params["conv1_w"], s1, b1))
    x2 = x1
    for i in range(blocks):
        s, b = _fold_bn(params["conv2_b"][i], *params["bn"][i])
        y = conv(x1, params["conv2_w"][i], s, b)
        if residual:
            y = y + x1
        x2 = jax.nn.relu(y)
        x1 = x2
    before = x2
    if pooling:
        N, H, W, C = x2.shape
        x2 = x2.reshape(N, H // 2, 2, W // 2, 2, C).max(axis=(2, 4))
    return (jnp.transpose(x2, (0, 3, 1, 2)),
            jnp.transpose(before, (0, 3, 1, 2)))


if __name__ == "__main__":
    N, Cin, H, W = 2, 4, 16, 16
    Cout = 8
    blocks = 2

    key = jax.random.PRNGKey(0)
    kp, kx = jax.random.split(key)
    params = init_params(kp, Cin, Cout, blocks)
    x = jax.random.normal(kx, (N, Cin, H, W), jnp.float32)

    fwd = jax.jit(functools.partial(down_coxvd_forward, blocks=blocks))
    pooled, before_pool = jax.block_until_ready(fwd(params, x))

    assert pooled.shape == (N, Cout, H // 2, W // 2), pooled.shape
    assert before_pool.shape == (N, Cout, H, W), before_pool.shape

    ref_pooled, ref_before = _ref_forward(params, x, blocks)
    ok = (jnp.allclose(pooled, ref_pooled, rtol=5e-2, atol=5e-2) and
          jnp.allclose(before_pool, ref_before, rtol=5e-2, atol=5e-2))
    if not bool(ok):
        raise AssertionError("Pallas kernel output does not match JAX reference")

    print("KERNEL_OK")
</pallas_src>

<mosaic_0001>
module attributes {stable_mosaic.version = 11 : i64} {
  func.func @_fused_down_kernel(%arg0: i32, %arg1: memref<1x16x64xbf16, #tpu.memory_space<vmem>>, %arg2: memref<3x64x128xbf16, #tpu.memory_space<vmem>>, %arg3: memref<3x128x128xbf16, #tpu.memory_space<vmem>>, %arg4: memref<3x128x128xbf16, #tpu.memory_space<vmem>>, %arg5: memref<1x128xf32, #tpu.memory_space<vmem>>, %arg6: memref<1x128xf32, #tpu.memory_space<vmem>>, %arg7: memref<1x128xf32, #tpu.memory_space<vmem>>, %arg8: memref<1x16x128xf32, #tpu.memory_space<vmem>>, %arg9: memref<1x8x64xf32, #tpu.memory_space<vmem>>, %arg10: memref<18x64xf32, #tpu.memory_space<vmem>>, %arg11: memref<18x128xf32, #tpu.memory_space<vmem>>, %arg12: memref<8x128xf32, #tpu.memory_space<vmem>>) attributes {dimension_semantics = [#tpu.dimension_semantics<parallel>], iteration_bounds = array<i64: 2>, scalar_prefetch = 0 : i64, scratch_operands = 3 : i64, tpu.core_type = #tpu.core_type<tc>, window_params = [{transform_indices = @transform_0, window_bounds = array<i64: 1, 16, 64>}, {pipeline_mode = #tpu.pipeline_mode<synchronous>, transform_indices = @transform_1, window_bounds = array<i64: 3, 64, 128>}, {pipeline_mode = #tpu.pipeline_mode<synchronous>, transform_indices = @transform_2, window_bounds = array<i64: 3, 128, 128>}, {pipeline_mode = #tpu.pipeline_mode<synchronous>, transform_indices = @transform_3, window_bounds = array<i64: 3, 128, 128>}, {pipeline_mode = #tpu.pipeline_mode<synchronous>, transform_indices = @transform_4, window_bounds = array<i64: 1, 128>}, {pipeline_mode = #tpu.pipeline_mode<synchronous>, transform_indices = @transform_5, window_bounds = array<i64: 1, 128>}, {pipeline_mode = #tpu.pipeline_mode<synchronous>, transform_indices = @transform_6, window_bounds = array<i64: 1, 128>}, {transform_indices = @transform_7, window_bounds = array<i64: 1, 16, 128>}, {transform_indices = @transform_8, window_bounds = array<i64: 1, 8, 64>}]} {
    %cst = arith.constant 0.000000e+00 : f32
    %0 = vector.broadcast %cst : f32 to vector<1x64xf32>
    %c0 = arith.constant 0 : index
    %c0_0 = arith.constant 0 : index
    %1 = vector.load %arg10[%c0, %c0_0] : memref<18x64xf32, #tpu.memory_space<vmem>>, vector<1x64xf32>
    tpu.vector_store %arg10[%c0, %c0_0], %0 {strides = array<i32>} : memref<18x64xf32, #tpu.memory_space<vmem>>, vector<1x64xf32>,
    %cst_1 = arith.constant 0.000000e+00 : f32
    %2 = vector.broadcast %cst_1 : f32 to vector<1x64xf32>
    %c17 = arith.constant 17 : index
    %c0_2 = arith.constant 0 : index
    %3 = vector.load %arg10[%c17, %c0_2] : memref<18x64xf32, #tpu.memory_space<vmem>>, vector<1x64xf32>
    tpu.vector_store %arg10[%c17, %c0_2], %2 {strides = array<i32>} : memref<18x64xf32, #tpu.memory_space<vmem>>, vector<1x64xf32>,
    %c0_3 = arith.constant 0 : index
    %c0_4 = arith.constant 0 : index
    %c0_5 = arith.constant 0 : index
    %4 = vector.load %arg1[%c0_3, %c0_4, %c0_5] : memref<1x16x64xbf16, #tpu.memory_space<vmem>>, vector<1x16x64xbf16>
    %5 = vector.shape_cast %4 : vector<1x16x64xbf16> to vector<16x64xbf16>
    %6 = arith.extf %5 : vector<16x64xbf16> to vector<16x64xf32>
    %c1 = arith.constant 1 : index
    %c0_6 = arith.constant 0 : index
    %7 = vector.load %arg10[%c1, %c0_6] : memref<18x64xf32, #tpu.memory_space<vmem>>, vector<16x64xf32>
    tpu.vector_store %arg10[%c1, %c0_6], %6 {strides = array<i32>} : memref<18x64xf32, #tpu.memory_space<vmem>>, vector<16x64xf32>,
    %cst_7 = arith.constant 0.000000e+00 : f32
    %8 = vector.broadcast %cst_7 : f32 to vector<1x128xf32>
    %c0_8 = arith.constant 0 : index
    %c0_9 = arith.constant 0 : index
    %9 = vector.load %arg11[%c0_8, %c0_9] : memref<18x128xf32, #tpu.memory_space<vmem>>, vector<1x128xf32>
    tpu.vector_store %arg11[%c0_8, %c0_9], %8 {strides = array<i32>} : memref<18x128xf32, #tpu.memory_space<vmem>>, vector<1x128xf32>,
    %cst_10 = arith.constant 0.000000e+00 : f32
    %10 = vector.broadcast %cst_10 : f32 to vector<1x128xf32>
    %c17_11 = arith.constant 17 : index
    %c0_12 = arith.constant 0 : index
    %11 = vector.load %arg11[%c17_11, %c0_12] : memref<18x128xf32, #tpu.memory_space<vmem>>, vector<1x128xf32>
    tpu.vector_store %arg11[%c17_11, %c0_12], %10 {strides = array<i32>} : memref<18x128xf32, #tpu.memory_space<vmem>>, vector<1x128xf32>,
    %c0_13 = arith.constant 0 : index
    %c0_14 = arith.constant 0 : index
    %12 = vector.load %arg10[%c0_13, %c0_14] : memref<18x64xf32, #tpu.memory_space<vmem>>, vector<16x64xf32>
    %13 = arith.truncf %12 : vector<16x64xf32> to vector<16x64xbf16>
    %c0_15 = arith.constant 0 : index
    %c0_16 = arith.constant 0 : index
    %c0_17 = arith.constant 0 : index
    %14 = vector.load %arg2[%c0_15, %c0_16, %c0_17] : memref<3x64x128xbf16, #tpu.memory_space<vmem>>, vector<1x64x128xbf16>
    %15 = vector.shape_cast %14 : vector<1x64x128xbf16> to vector<64x128xbf16>
    %cst_18 = arith.constant dense<0.000000e+00> : vector<16x128xf32>
    %16 = tpu.matmul %13, %15, %cst_18 {dimension_numbers = #tpu.dot_dimension_numbers<[1], [0], [0], [1], [0, 0, 1, 1], [], []>} : vector<16x64xbf16>, vector<64x128xbf16>, vector<16x128xf32> -> vector<16x128xf32>
    %c1_19 = arith.constant 1 : index
    %c0_20 = arith.constant 0 : index
    %17 = vector.load %arg10[%c1_19, %c0_20] : memref<18x64xf32, #tpu.memory_space<vmem>>, vector<16x64xf32>
    %18 = arith.truncf %17 : vector<16x64xf32> to vector<16x64xbf16>
    %c1_21 = arith.constant 1 : index
    %c0_22 = arith.constant 0 : index
    %c0_23 = arith.constant 0 : index
    %19 = vector.load %arg2[%c1_21, %c0_22, %c0_23] : memref<3x64x128xbf16, #tpu.memory_space<vmem>>, vector<1x64x128xbf16>
    %20 = vector.shape_cast %19 : vector<1x64x128xbf16> to vector<64x128xbf16>
    %cst_24 = arith.constant dense<0.000000e+00> : vector<16x128xf32>
    %21 = tpu.matmul %18, %20, %cst_24 {dimension_numbers = #tpu.dot_dimension_numbers<[1], [0], [0], [1], [0, 0, 1, 1], [], []>} : vector<16x64xbf16>, vector<64x128xbf16>, vector<16x128xf32> -> vector<16x128xf32>
    %22 = arith.addf %16, %21 : vector<16x128xf32>
    %c2 = arith.constant 2 : index
    %c0_25 = arith.constant 0 : index
    %23 = vector.load %arg10[%c2, %c0_25] : memref<18x64xf32, #tpu.memory_space<vmem>>, vector<16x64xf32>
    %24 = arith.truncf %23 : vector<16x64xf32> to vector<16x64xbf16>
    %c2_26 = arith.constant 2 : index
    %c0_27 = arith.constant 0 : index
    %c0_28 = arith.constant 0 : index
    %25 = vector.load %arg2[%c2_26, %c0_27, %c0_28] : memref<3x64x128xbf16, #tpu.memory_space<vmem>>, vector<1x64x128xbf16>
    %26 = vector.shape_cast %25 : vector<1x64x128xbf16> to vector<64x128xbf16>
    %cst_29 = arith.constant dense<0.000000e+00> : vector<16x128xf32>
    %27 = tpu.matmul %24, %26, %cst_29 {dimension_numbers = #tpu.dot_dimension_numbers<[1], [0], [0], [1], [0, 0, 1, 1], [], []>} : vector<16x64xbf16>, vector<64x128xbf16>, vector<16x128xf32> -> vector<16x128xf32>
    %28 = arith.addf %22, %27 : vector<16x128xf32>
    %c0_30 = arith.constant 0 : index
    %c0_31 = arith.constant 0 : index
    %29 = vector.load %arg5[%c0_30, %c0_31] : memref<1x128xf32, #tpu.memory_space<vmem>>, vector<1x128xf32>
    %30 = vector.broadcast %29 : vector<1x128xf32> to vector<16x128xf32>
    %31 = arith.addf %28, %30 : vector<16x128xf32>
    %cst_32 = arith.constant 0.000000e+00 : f32
    %32 = vector.broadcast %cst_32 : f32 to vector<16x128xf32>
    %33 = arith.maximumf %31, %32 : vector<16x128xf32>
    %c1_33 = arith.constant 1 : index
    %c0_34 = arith.constant 0 : index
    %34 = vector.load %arg11[%c1_33, %c0_34] : memref<18x128xf32, #tpu.memory_space<vmem>>, vector<16x128xf32>
    tpu.vector_store %arg11[%c1_33, %c0_34], %33 {strides = array<i32>} : memref<18x128xf32, #tpu.memory_space<vmem>>, vector<16x128xf32>,
    %c0_35 = arith.constant 0 : index
    %c0_36 = arith.constant 0 : index
    %35 = vector.load %arg11[%c0_35, %c0_36] : memref<18x128xf32, #tpu.memory_space<vmem>>, vector<16x128xf32>
    %36 = arith.truncf %35 : vector<16x128xf32> to vector<16x128xbf16>
    %c0_37 = arith.constant 0 : index
    %c0_38 = arith.constant 0 : index
    %c0_39 = arith.constant 0 : index
    %37 = vector.load %arg3[%c0_37, %c0_38, %c0_39] : memref<3x128x128xbf16, #tpu.memory_space<vmem>>, vector<1x128x128xbf16>
    %38 = vector.shape_cast %37 : vector<1x128x128xbf16> to vector<128x128xbf16>
    %cst_40 = arith.constant dense<0.000000e+00> : vector<16x128xf32>
    %39 = tpu.matmul %36, %38, %cst_40 {dimension_numbers = #tpu.dot_dimension_numbers<[1], [0], [0], [1], [0, 0, 1, 1], [], []>} : vector<16x128xbf16>, vector<128x128xbf16>, vector<16x128xf32> -> vector<16x128xf32>
    %c1_41 = arith.constant 1 : index
    %c0_42 = arith.constant 0 : index
    %40 = vector.load %arg11[%c1_41, %c0_42] : memref<18x128xf32, #tpu.memory_space<vmem>>, vector<16x128xf32>
    %41 = arith.truncf %40 : vector<16x128xf32> to vector<16x128xbf16>
    %c1_43 = arith.constant 1 : index
    %c0_44 = arith.constant 0 : index
    %c0_45 = arith.constant 0 : index
    %42 = vector.load %arg3[%c1_43, %c0_44, %c0_45] : memref<3x128x128xbf16, #tpu.memory_space<vmem>>, vector<1x128x128xbf16>
    %43 = vector.shape_cast %42 : vector<1x128x128xbf16> to vector<128x128xbf16>
    %cst_46 = arith.constant dense<0.000000e+00> : vector<16x128xf32>
    %44 = tpu.matmul %41, %43, %cst_46 {dimension_numbers = #tpu.dot_dimension_numbers<[1], [0], [0], [1], [0, 0, 1, 1], [], []>} : vector<16x128xbf16>, vector<128x128xbf16>, vector<16x128xf32> -> vector<16x128xf32>
    %45 = arith.addf %39, %44 : vector<16x128xf32>
    %c2_47 = arith.constant 2 : index
    %c0_48 = arith.constant 0 : index
    %46 = vector.load %arg11[%c2_47, %c0_48] : memref<18x128xf32, #tpu.memory_space<vmem>>, vector<16x128xf32>
    %47 = arith.truncf %46 : vector<16x128xf32> to vector<16x128xbf16>
    %c2_49 = arith.constant 2 : index
    %c0_50 = arith.constant 0 : index
    %c0_51 = arith.constant 0 : index
    %48 = vector.load %arg3[%c2_49, %c0_50, %c0_51] : memref<3x128x128xbf16, #tpu.memory_space<vmem>>, vector<1x128x128xbf16>
    %49 = vector.shape_cast %48 : vector<1x128x128xbf16> to vector<128x128xbf16>
    %cst_52 = arith.constant dense<0.000000e+00> : vector<16x128xf32>
    %50 = tpu.matmul %47, %49, %cst_52 {dimension_numbers = #tpu.dot_dimension_numbers<[1], [0], [0], [1], [0, 0, 1, 1], [], []>} : vector<16x128xbf16>, vector<128x128xbf16>, vector<16x128xf32> -> vector<16x128xf32>
    %51 = arith.addf %45, %50 : vector<16x128xf32>
    %c0_53 = arith.constant 0 : index
    %c0_54 = arith.constant 0 : index
    %52 = vector.load %arg6[%c0_53, %c0_54] : memref<1x128xf32, #tpu.memory_space<vmem>>, vector<1x128xf32>
    %53 = vector.broadcast %52 : vector<1x128xf32> to vector<16x128xf32>
    %54 = arith.addf %51, %53 : vector<16x128xf32>
    %c1_55 = arith.constant 1 : index
    %c0_56 = arith.constant 0 : index
    %55 = vector.load %arg11[%c1_55, %c0_56] : memref<18x128xf32, #tpu.memory_space<vmem>>, vector<16x128xf32>
    %56 = arith.addf %54, %55 : vector<16x128xf32>
    %cst_57 = arith.constant 0.000000e+00 : f32
    %57 = vector.broadcast %cst_57 : f32 to vector<16x128xf32>
    %58 = arith.maximumf %56, %57 : vector<16x128xf32>
    %c1_58 = arith.constant 1 : index
    %c0_59 = arith.constant 0 : index
    %59 = vector.load %arg11[%c1_58, %c0_59] : memref<18x128xf32, #tpu.memory_space<vmem>>, vector<16x128xf32>
    tpu.vector_store %arg11[%c1_58, %c0_59], %58 {strides = array<i32>} : memref<18x128xf32, #tpu.memory_space<vmem>>, vector<16x128xf32>,
    %c0_60 = arith.constant 0 : index
    %c0_61 = arith.constant 0 : index
    %60 = vector.load %arg11[%c0_60, %c0_61] : memref<18x128xf32, #tpu.memory_space<vmem>>, vector<16x128xf32>
    %61 = arith.truncf %60 : vector<16x128xf32> to vector<16x128xbf16>
    %c0_62 = arith.constant 0 : index
    %c0_63 = arith.constant 0 : index
    %c0_64 = arith.constant 0 : index
    %62 = vector.load %arg4[%c0_62, %c0_63, %c0_64] : memref<3x128x128xbf16, #tpu.memory_space<vmem>>, vector<1x128x128xbf16>
    %63 = vector.shape_cast %62 : vector<1x128x128xbf16> to vector<128x128xbf16>
    %cst_65 = arith.constant dense<0.000000e+00> : vector<16x128xf32>
    %64 = tpu.matmul %61, %63, %cst_65 {dimension_numbers = #tpu.dot_dimension_numbers<[1], [0], [0], [1], [0, 0, 1, 1], [], []>} : vector<16x128xbf16>, vector<128x128xbf16>, vector<16x128xf32> -> vector<16x128xf32>
    %c1_66 = arith.constant 1 : index
    %c0_67 = arith.constant 0 : index
    %65 = vector.load %arg11[%c1_66, %c0_67] : memref<18x128xf32, #tpu.memory_space<vmem>>, vector<16x128xf32>
    %66 = arith.truncf %65 : vector<16x128xf32> to vector<16x128xbf16>
    %c1_68 = arith.constant 1 : index
    %c0_69 = arith.constant 0 : index
    %c0_70 = arith.constant 0 : index
    %67 = vector.load %arg4[%c1_68, %c0_69, %c0_70] : memref<3x128x128xbf16, #tpu.memory_space<vmem>>, vector<1x128x128xbf16>
    %68 = vector.shape_cast %67 : vector<1x128x128xbf16> to vector<128x128xbf16>
    %cst_71 = arith.constant dense<0.000000e+00> : vector<16x128xf32>
    %69 = tpu.matmul %66, %68, %cst_71 {dimension_numbers = #tpu.dot_dimension_numbers<[1], [0], [0], [1], [0, 0, 1, 1], [], []>} : vector<16x128xbf16>, vector<128x128xbf16>, vector<16x128xf32> -> vector<16x128xf32>
    %70 = arith.addf %64, %69 : vector<16x128xf32>
    %c2_72 = arith.constant 2 : index
    %c0_73 = arith.constant 0 : index
    %71 = vector.load %arg11[%c2_72, %c0_73] : memref<18x128xf32, #tpu.memory_space<vmem>>, vector<16x128xf32>
    %72 = arith.truncf %71 : vector<16x128xf32> to vector<16x128xbf16>
    %c2_74 = arith.constant 2 : index
    %c0_75 = arith.constant 0 : index
    %c0_76 = arith.constant 0 : index
    %73 = vector.load %arg4[%c2_74, %c0_75, %c0_76] : memref<3x128x128xbf16, #tpu.memory_space<vmem>>, vector<1x128x128xbf16>
    %74 = vector.shape_cast %73 : vector<1x128x128xbf16> to vector<128x128xbf16>
    %cst_77 = arith.constant dense<0.000000e+00> : vector<16x128xf32>
    %75 = tpu.matmul %72, %74, %cst_77 {dimension_numbers = #tpu.dot_dimension_numbers<[1], [0], [0], [1], [0, 0, 1, 1], [], []>} : vector<16x128xbf16>, vector<128x128xbf16>, vector<16x128xf32> -> vector<16x128xf32>
    %76 = arith.addf %70, %75 : vector<16x128xf32>
    %c0_78 = arith.constant 0 : index
    %c0_79 = arith.constant 0 : index
    %77 = vector.load %arg7[%c0_78, %c0_79] : memref<1x128xf32, #tpu.memory_space<vmem>>, vector<1x128xf32>
    %78 = vector.broadcast %77 : vector<1x128xf32> to vector<16x128xf32>
    %79 = arith.addf %76, %78 : vector<16x128xf32>
    %c1_80 = arith.constant 1 : index
    %c0_81 = arith.constant 0 : index
    %80 = vector.load %arg11[%c1_80, %c0_81] : memref<18x128xf32, #tpu.memory_space<vmem>>, vector<16x128xf32>
    %81 = arith.addf %79, %80 : vector<16x128xf32>
    %cst_82 = arith.constant 0.000000e+00 : f32
    %82 = vector.broadcast %cst_82 : f32 to vector<16x128xf32>
    %83 = arith.maximumf %81, %82 : vector<16x128xf32>
    %c1_83 = arith.constant 1 : index
    %c0_84 = arith.constant 0 : index
    %84 = vector.load %arg11[%c1_83, %c0_84] : memref<18x128xf32, #tpu.memory_space<vmem>>, vector<16x128xf32>
    tpu.vector_store %arg11[%c1_83, %c0_84], %83 {strides = array<i32>} : memref<18x128xf32, #tpu.memory_space<vmem>>, vector<16x128xf32>,
    %c0_85 = arith.constant 0 : index
    %c0_86 = arith.constant 0 : index
    %c0_87 = arith.constant 0 : index
    %85 = vector.load %arg8[%c0_85, %c0_86, %c0_87] : memref<1x16x128xf32, #tpu.memory_space<vmem>>, vector<1x16x128xf32>
    %86 = vector.shape_cast %85 : vector<1x16x128xf32> to vector<16x128xf32>
    %87 = vector.shape_cast %83 : vector<16x128xf32> to vector<1x16x128xf32>
    tpu.vector_store %arg8[%c0_85, %c0_86, %c0_87], %87 {strides = array<i32>} : memref<1x16x128xf32, #tpu.memory_space<vmem>>, vector<1x16x128xf32>,
    %c1_88 = arith.constant 1 : index
    %c0_89 = arith.constant 0 : index
    %88 = tpu.strided_load %arg11[%c1_88, %c0_89] {strides = array<i32: 2, 1>} : memref<18x128xf32, #tpu.memory_space<vmem>>, vector<8x128xf32>
    %c2_90 = arith.constant 2 : index
    %c0_91 = arith.constant 0 : index
    %89 = tpu.strided_load %arg11[%c2_90, %c0_91] {strides = array<i32: 2, 1>} : memref<18x128xf32, #tpu.memory_space<vmem>>, vector<8x128xf32>
    %90 = arith.maximumf %88, %89 : vector<8x128xf32>
    %c0_92 = arith.constant 0 : index
    %c0_93 = arith.constant 0 : index
    %91 = vector.load %arg12[%c0_92, %c0_93] : memref<8x128xf32, #tpu.memory_space<vmem>>, vector<8x128xf32>
    tpu.vector_store %arg12[%c0_92, %c0_93], %90 {strides = array<i32>} : memref<8x128xf32, #tpu.memory_space<vmem>>, vector<8x128xf32>,
    %c0_94 = arith.constant 0 : index
    %c0_95 = arith.constant 0 : index
    %92 = vector.load %arg12[%c0_94, %c0_95] : memref<8x128xf32, #tpu.memory_space<vmem>>, vector<8x8xf32>
    %c0_96 = arith.constant 0 : index
    %c8 = arith.constant 8 : index
    %93 = vector.load %arg12[%c0_96, %c8] : memref<8x128xf32, #tpu.memory_space<vmem>>, vector<8x8xf32>
    %94 = arith.maximumf %92, %93 : vector<8x8xf32>
    %c0_97 = arith.constant 0 : index
    %c0_98 = arith.constant 0 : index
    %c0_99 = arith.constant 0 : index
    %95 = vector.load %arg9[%c0_97, %c0_98, %c0_99] : memref<1x8x64xf32, #tpu.memory_space<vmem>>, vector<1x8x8xf32>
    %96 = vector.shape_cast %95 : vector<1x8x8xf32> to vector<8x8xf32>
    %97 = vector.shape_cast %94 : vector<8x8xf32> to vector<1x8x8xf32>
    tpu.vector_store %arg9[%c0_97, %c0_98, %c0_99], %97 {strides = array<i32>} : memref<1x8x64xf32, #tpu.memory_space<vmem>>, vector<1x8x8xf32>,
    %c0_100 = arith.constant 0 : index
    %c16 = arith.constant 16 : index
    %98 = vector.load %arg12[%c0_100, %c16] : memref<8x128xf32, #tpu.memory_space<vmem>>, vector<8x8xf32>
    %c0_101 = arith.constant 0 : index
    %c24 = arith.constant 24 : index
    %99 = vector.load %arg12[%c0_101, %c24] : memref<8x128xf32, #tpu.memory_space<vmem>>, vector<8x8xf32>
    %100 = arith.maximumf %98, %99 : vector<8x8xf32>
    %c0_102 = arith.constant 0 : index
    %c0_103 = arith.constant 0 : index
    %c8_104 = arith.constant 8 : index
    %101 = vector.load %arg9[%c0_102, %c0_103, %c8_104] : memref<1x8x64xf32, #tpu.memory_space<vmem>>, vector<1x8x8xf32>
    %102 = vector.shape_cast %101 : vector<1x8x8xf32> to vector<8x8xf32>
    %103 = vector.shape_cast %100 : vector<8x8xf32> to vector<1x8x8xf32>
    tpu.vector_store %arg9[%c0_102, %c0_103, %c8_104], %103 {strides = array<i32>} : memref<1x8x64xf32, #tpu.memory_space<vmem>>, vector<1x8x8xf32>,
    %c0_105 = arith.constant 0 : index
    %c32 = arith.constant 32 : index
    %104 = vector.load %arg12[%c0_105, %c32] : memref<8x128xf32, #tpu.memory_space<vmem>>, vector<8x8xf32>
    %c0_106 = arith.constant 0 : index
    %c40 = arith.constant 40 : index
    %105 = vector.load %arg12[%c0_106, %c40] : memref<8x128xf32, #tpu.memory_space<vmem>>, vector<8x8xf32>
    %106 = arith.maximumf %104, %105 : vector<8x8xf32>
    %c0_107 = arith.constant 0 : index
    %c0_108 = arith.constant 0 : index
    %c16_109 = arith.constant 16 : index
    %107 = vector.load %arg9[%c0_107, %c0_108, %c16_109] : memref<1x8x64xf32, #tpu.memory_space<vmem>>, vector<1x8x8xf32>
    %108 = vector.shape_cast %107 : vector<1x8x8xf32> to vector<8x8xf32>
    %109 = vector.shape_cast %106 : vector<8x8xf32> to vector<1x8x8xf32>
    tpu.vector_store %arg9[%c0_107, %c0_108, %c16_109], %109 {strides = array<i32>} : memref<1x8x64xf32, #tpu.memory_space<vmem>>, vector<1x8x8xf32>,
    %c0_110 = arith.constant 0 : index
    %c48 = arith.constant 48 : index
    %110 = vector.load %arg12[%c0_110, %c48] : memref<8x128xf32, #tpu.memory_space<vmem>>, vector<8x8xf32>
    %c0_111 = arith.constant 0 : index
    %c56 = arith.constant 56 : index
    %111 = vector.load %arg12[%c0_111, %c56] : memref<8x128xf32, #tpu.memory_space<vmem>>, vector<8x8xf32>
    %112 = arith.maximumf %110, %111 : vector<8x8xf32>
    %c0_112 = arith.constant 0 : index
    %c0_113 = arith.constant 0 : index
    %c24_114 = arith.constant 24 : index
    %113 = vector.load %arg9[%c0_112, %c0_113, %c24_114] : memref<1x8x64xf32, #tpu.memory_space<vmem>>, vector<1x8x8xf32>
    %114 = vector.shape_cast %113 : vector<1x8x8xf32> to vector<8x8xf32>
    %115 = vector.shape_cast %112 : vector<8x8xf32> to vector<1x8x8xf32>
    tpu.vector_store %arg9[%c0_112, %c0_113, %c24_114], %115 {strides = array<i32>} : memref<1x8x64xf32, #tpu.memory_space<vmem>>, vector<1x8x8xf32>,
    %c0_115 = arith.constant 0 : index
    %c64 = arith.constant 64 : index
    %116 = vector.load %arg12[%c0_115, %c64] : memref<8x128xf32, #tpu.memory_space<vmem>>, vector<8x8xf32>
    %c0_116 = arith.constant 0 : index
    %c72 = arith.constant 72 : index
    %117 = vector.load %arg12[%c0_116, %c72] : memref<8x128xf32, #tpu.memory_space<vmem>>, vector<8x8xf32>
    %118 = arith.maximumf %116, %117 : vector<8x8xf32>
    %c0_117 = arith.constant 0 : index
    %c0_118 = arith.constant 0 : index
    %c32_119 = arith.constant 32 : index
    %119 = vector.load %arg9[%c0_117, %c0_118, %c32_119] : memref<1x8x64xf32, #tpu.memory_space<vmem>>, vector<1x8x8xf32>
    %120 = vector.shape_cast %119 : vector<1x8x8xf32> to vector<8x8xf32>
    %121 = vector.shape_cast %118 : vector<8x8xf32> to vector<1x8x8xf32>
    tpu.vector_store %arg9[%c0_117, %c0_118, %c32_119], %121 {strides = array<i32>} : memref<1x8x64xf32, #tpu.memory_space<vmem>>, vector<1x8x8xf32>,
    %c0_120 = arith.constant 0 : index
    %c80 = arith.constant 80 : index
    %122 = vector.load %arg12[%c0_120, %c80] : memref<8x128xf32, #tpu.memory_space<vmem>>, vector<8x8xf32>
    %c0_121 = arith.constant 0 : index
    %c88 = arith.constant 88 : index
    %123 = vector.load %arg12[%c0_121, %c88] : memref<8x128xf32, #tpu.memory_space<vmem>>, vector<8x8xf32>
    %124 = arith.maximumf %122, %123 : vector<8x8xf32>
    %c0_122 = arith.constant 0 : index
    %c0_123 = arith.constant 0 : index
    %c40_124 = arith.constant 40 : index
    %125 = vector.load %arg9[%c0_122, %c0_123, %c40_124] : memref<1x8x64xf32, #tpu.memory_space<vmem>>, vector<1x8x8xf32>
    %126 = vector.shape_cast %125 : vector<1x8x8xf32> to vector<8x8xf32>
    %127 = vector.shape_cast %124 : vector<8x8xf32> to vector<1x8x8xf32>
    tpu.vector_store %arg9[%c0_122, %c0_123, %c40_124], %127 {strides = array<i32>} : memref<1x8x64xf32, #tpu.memory_space<vmem>>, vector<1x8x8xf32>,
    %c0_125 = arith.constant 0 : index
    %c96 = arith.constant 96 : index
    %128 = vector.load %arg12[%c0_125, %c96] : memref<8x128xf32, #tpu.memory_space<vmem>>, vector<8x8xf32>
    %c0_126 = arith.constant 0 : index
    %c104 = arith.constant 104 : index
    %129 = vector.load %arg12[%c0_126, %c104] : memref<8x128xf32, #tpu.memory_space<vmem>>, vector<8x8xf32>
    %130 = arith.maximumf %128, %129 : vector<8x8xf32>
    %c0_127 = arith.constant 0 : index
    %c0_128 = arith.constant 0 : index
    %c48_129 = arith.constant 48 : index
    %131 = vector.load %arg9[%c0_127, %c0_128, %c48_129] : memref<1x8x64xf32, #tpu.memory_space<vmem>>, vector<1x8x8xf32>
    %132 = vector.shape_cast %131 : vector<1x8x8xf32> to vector<8x8xf32>
    %133 = vector.shape_cast %130 : vector<8x8xf32> to vector<1x8x8xf32>
    tpu.vector_store %arg9[%c0_127, %c0_128, %c48_129], %133 {strides = array<i32>} : memref<1x8x64xf32, #tpu.memory_space<vmem>>, vector<1x8x8xf32>,
    %c0_130 = arith.constant 0 : index
    %c112 = arith.constant 112 : index
    %134 = vector.load %arg12[%c0_130, %c112] : memref<8x128xf32, #tpu.memory_space<vmem>>, vector<8x8xf32>
    %c0_131 = arith.constant 0 : index
    %c120 = arith.constant 120 : index
    %135 = vector.load %arg12[%c0_131, %c120] : memref<8x128xf32, #tpu.memory_space<vmem>>, vector<8x8xf32>
    %136 = arith.maximumf %134, %135 : vector<8x8xf32>
    %c0_132 = arith.constant 0 : index
    %c0_133 = arith.constant 0 : index
    %c56_134 = arith.constant 56 : index
    %137 = vector.load %arg9[%c0_132, %c0_133, %c56_134] : memref<1x8x64xf32, #tpu.memory_space<vmem>>, vector<1x8x8xf32>
    %138 = vector.shape_cast %137 : vector<1x8x8xf32> to vector<8x8xf32>
    %139 = vector.shape_cast %136 : vector<8x8xf32> to vector<1x8x8xf32>
    tpu.vector_store %arg9[%c0_132, %c0_133, %c56_134], %139 {strides = array<i32>} : memref<1x8x64xf32, #tpu.memory_space<vmem>>, vector<1x8x8xf32>,
    return
  }
  func.func @transform_0(%arg0: i32) -> (i32, i32, i32) {
    %c0_i32 = arith.constant 0 : i32
    %c0_i32_0 = arith.constant 0 : i32
    %c0_i32_1 = arith.constant 0 : i32
    return %arg0, %c0_i32, %c0_i32_0 : i32, i32, i32
  }
  func.func @transform_1(%arg0: i32) -> (i32, i32, i32) {
    %c0_i32 = arith.constant 0 : i32
    %c0_i32_0 = arith.constant 0 : i32
    %c0_i32_1 = arith.constant 0 : i32
    %c0_i32_2 = arith.constant 0 : i32
    return %c0_i32, %c0_i32_0, %c0_i32_1 : i32, i32, i32
  }
  func.func @transform_2(%arg0: i32) -> (i32, i32, i32) {
    %c0_i32 = arith.constant 0 : i32
    %c0_i32_0 = arith.constant 0 : i32
    %c0_i32_1 = arith.constant 0 : i32
    %c0_i32_2 = arith.constant 0 : i32
    return %c0_i32, %c0_i32_0, %c0_i32_1 : i32, i32, i32
  }
  func.func @transform_3(%arg0: i32) -> (i32, i32, i32) {
    %c0_i32 = arith.constant 0 : i32
    %c0_i32_0 = arith.constant 0 : i32
    %c0_i32_1 = arith.constant 0 : i32
    %c0_i32_2 = arith.constant 0 : i32
    return %c0_i32, %c0_i32_0, %c0_i32_1 : i32, i32, i32
  }
  func.func @transform_4(%arg0: i32) -> (i32, i32) {
    %c0_i32 = arith.constant 0 : i32
    %c0_i32_0 = arith.constant 0 : i32
    %c0_i32_1 = arith.constant 0 : i32
    return %c0_i32, %c0_i32_0 : i32, i32
  }
  func.func @transform_5(%arg0: i32) -> (i32, i32) {
    %c0_i32 = arith.constant 0 : i32
    %c0_i32_0 = arith.constant 0 : i32
    %c0_i32_1 = arith.constant 0 : i32
    return %c0_i32, %c0_i32_0 : i32, i32
  }
  func.func @transform_6(%arg0: i32) -> (i32, i32) {
    %c0_i32 = arith.constant 0 : i32
    %c0_i32_0 = arith.constant 0 : i32
    %c0_i32_1 = arith.constant 0 : i32
    return %c0_i32, %c0_i32_0 : i32, i32
  }
  func.func @transform_7(%arg0: i32) -> (i32, i32, i32) {
    %c0_i32 = arith.constant 0 : i32
    %c0_i32_0 = arith.constant 0 : i32
    %c0_i32_1 = arith.constant 0 : i32
    return %arg0, %c0_i32, %c0_i32_0 : i32, i32, i32
  }
  func.func @transform_8(%arg0: i32) -> (i32, i32, i32) {
    %c0_i32 = arith.constant 0 : i32
    %c0_i32_0 = arith.constant 0 : i32
    %c0_i32_1 = arith.constant 0 : i32
    return %arg0, %c0_i32, %c0_i32_0 : i32, i32, i32
  }
}

</mosaic_0001>

<bundles_post_ra>
// kernel: tile.18
= control target key start
LH: loop header
LB: loop body
LE: loop exit
PB: predicated region body
PF: predicated region fallthrough
CT: control target
= control target key end

     0   :  { %s28_s0 = inlined_call_operand.vmem [shape: f32[8], index: 0, kind: input, shape index: {}]   ;;  %s29_s1 = inlined_call_operand.vmem [shape: f32[16,8], index: 1, kind: output, shape index: {}]  }
   0x1   :  { %v4_v0 = vld [vmem:[%s28_s0] ss:$0 sm:$0xff] }
   0x2   :  { %5 = vst [vmem:[%s29_s1] sm:$0xff] %v4_v0  ;;  %8 = vst [vmem:[%s29_s1 + $0x8] sm:$0xff] %v4_v0 }

// kernel: tile.19
= control target key start
LH: loop header
LB: loop body
LE: loop exit
PB: predicated region body
PF: predicated region fallthrough
CT: control target
= control target key end

     0   :  { %s131_s10 = smov 120   ;;  %s132_s11 = smov 104   ;;  %vm3_vm0 = vcmask 64512   ;;  %vm9_vm1 = vcmask 1048512   ;;  %vm15_vm2 = vcmask 982912   ;;  %vm21_vm3 = vcmask 917312   ;;  %s207_s0 = inlined_call_operand.vmem [shape: f32[16,8], index: 0, kind: input, shape index: {}]   ;;  %s208_s1 = inlined_call_operand.vmem [shape: f32[1,128], index: 1, kind: output, shape index: {}]  }
   0x1   :  { %v101_v0 = vld [vmem:[%s207_s0 + $0xf] sm:$0x1]   ;;  %v103_v1 = vld [vmem:[%s207_s0 + $0xd] sm:$0x1]   ;;  %v102_v2 = vld [vmem:[%s207_s0 + $0xe] sm:$0x1]  }
   0x2   :  { %7 = vrot.lane.b32.xlu0 %v101_v0, %s131_s10  ;;  %19 = vrot.lane.b32.xlu1 %v103_v1, %s132_s11  ;;  %v104_v3 = vld [vmem:[%s207_s0 + $0xc] sm:$0x1]   ;;  %s133_s16 = smov 112   ;;  %s134_s17 = smov 96   ;;  %v105_v4 = vld [vmem:[%s207_s0 + $0xb] sm:$0x1]  }
   0x3   :  { %v106_v5 = vld [vmem:[%s207_s0 + $0xa] sm:$0x1]   ;;  %v2_v6 = vld [vmem:[%s207_s0] sm:$0x1]   ;;  %s135_s24 = smov 88   ;;  %s136_s25 = smov 80  }
   0x4   :  { %4 = vst.msk [vmem:[#allocation0] sm:$0x1] %vm3_vm0, %v2_v6   ;;  %v107_v7 = vld [vmem:[%s207_s0 + $0x9] sm:$0x1]   ;;  %v108_v8 = vld [vmem:[%s207_s0 + $0x8] sm:$0x1]  }
   0x5   :  { %s137_s30 = smov 72   ;;  %s138_s2 = smov 64   ;;  %v109_v9 = vld [vmem:[%s207_s0 + $0x7] sm:$0x1]   ;;  %v110_v10 = vld [vmem:[%s207_s0 + $0x6] sm:$0x1]  }
   0x6   :  { %13 = vrot.lane.b32.xlu0 %v102_v2, %s133_s16  ;;  %25 = vrot.lane.b32.xlu1 %v104_v3, %s134_s17  ;;  %s139_s7 = smov 56   ;;  %s140_s8 = smov 48   ;;  %v111_v11 = vld [vmem:[%s207_s0 + $0x5] sm:$0x1]   ;;  %v112_v12 = vld [vmem:[%s207_s0 + $0x4] sm:$0x1]  }
   0x7   :  { %s141_s13 = smov 40   ;;  %s142_s14 = smov 32   ;;  %v113_v13 = vld [vmem:[%s207_s0 + $0x3] sm:$0x1]   ;;  %v114_v14 = vld [vmem:[%s207_s0 + $0x2] sm:$0x1]  }
   0x8   :  { %s143_s19 = smov 24   ;;  %s144_s20 = smov 16   ;;  %v115_v15 = vld [vmem:[%s207_s0 + $0x1] sm:$0x1]   ;;  %vm27_vm4 = vcmask 851712   ;;  %vm33_vm5 = vcmask 786112  }
   0x9   :  { %s145_s0 = smov 8   ;;  %vm39_vm6 = vcmask 720512   ;;  %vm45_vm7 = vcmask 654912   ;;  %vm51_vm8 = vcmask 589312   ;;  %vm57_vm9 = vcmask 523712  }
   0xa   :  { %31 = vrot.lane.b32.xlu0 %v105_v4, %s135_s24  ;;  %37 = vrot.lane.b32.xlu1 %v106_v5, %s136_s25  ;;  %vm63_vm10 = vcmask 458112   ;;  %vm69_vm11 = vcmask 392512   ;;  %vm75_vm12 = vcmask 326912   ;;  %vm81_vm13 = vcmask 261312  }
   0xb   :  { %vm87_vm14 = vcmask 195712   ;;  %vm93_vm15 = vcmask 130112  }
   0xe   :  { %43 = vrot.lane.b32.xlu0 %v107_v7, %s137_s30  ;;  %49 = vrot.lane.b32.xlu1 %v108_v8, %s138_s2 }
  0x12   :  { %55 = vrot.lane.b32.xlu0 %v109_v9, %s139_s7  ;;  %61 = vrot.lane.b32.xlu1 %v110_v10, %s140_s8 }
  0x16   :  { %67 = vrot.lane.b32.xlu0 %v111_v11, %s141_s13  ;;  %73 = vrot.lane.b32.xlu1 %v112_v12, %s142_s14 }
  0x1a   :  { %79 = vrot.lane.b32.xlu0 %v113_v13, %s143_s19  ;;  %85 = vrot.lane.b32.xlu1 %v114_v14, %s144_s20 }
  0x1e   :  { %91 = vrot.lane.b32.xlu0 %v115_v15, %s145_s0 }
  0x74   :  { %v8_v16 = vpop.permute.xlu0 %7   ;;  %v20_v17 = vpop.permute.xlu1 %19  }
  0x75   :  { %10 = vst.msk [vmem:[#allocation0] sm:$0x1] %vm9_vm1, %v8_v16  }
  0x78   :  { %v14_v18 = vpop.permute.xlu0 %13   ;;  %v26_v19 = vpop.permute.xlu1 %25  }
  0x79   :  { %16 = vst.msk [vmem:[#allocation0] sm:$0x1] %vm15_vm2, %v14_v18  }
  0x7a   :  { %22 = vst.msk [vmem:[#allocation0] sm:$0x1] %vm21_vm3, %v20_v17  }
  0x7b   :  { %28 = vst.msk [vmem:[#allocation0] sm:$0x1] %vm27_vm4, %v26_v19  }
  0x7c   :  { %v32_v20 = vpop.permute.xlu0 %31   ;;  %v38_v21 = vpop.permute.xlu1 %37  }
  0x7d   :  { %34 = vst.msk [vmem:[#allocation0] sm:$0x1] %vm33_vm5, %v32_v20  }
  0x7e   :  { %40 = vst.msk [vmem:[#allocation0] sm:$0x1] %vm39_vm6, %v38_v21  }
  0x80   :  { %v44_v22 = vpop.permute.xlu0 %43   ;;  %v50_v23 = vpop.permute.xlu1 %49  }
  0x81   :  { %46 = vst.msk [vmem:[#allocation0] sm:$0x1] %vm45_vm7, %v44_v22  }
  0x82   :  { %52 = vst.msk [vmem:[#allocation0] sm:$0x1] %vm51_vm8, %v50_v23  }
  0x84   :  { %v56_v24 = vpop.permute.xlu0 %55   ;;  %v62_v25 = vpop.permute.xlu1 %61  }
  0x85   :  { %58 = vst.msk [vmem:[#allocation0] sm:$0x1] %vm57_vm9, %v56_v24  }
  0x86   :  { %64 = vst.msk [vmem:[#allocation0] sm:$0x1] %vm63_vm10, %v62_v25  }
  0x88   :  { %v68_v26 = vpop.permute.xlu0 %67   ;;  %v74_v27 = vpop.permute.xlu1 %73  }
  0x89   :  { %70 = vst.msk [vmem:[#allocation0] sm:$0x1] %vm69_vm11, %v68_v26  }
  0x8a   :  { %76 = vst.msk [vmem:[#allocation0] sm:$0x1] %vm75_vm12, %v74_v27  }
  0x8c   :  { %v80_v28 = vpop.permute.xlu0 %79   ;;  %v86_v29 = vpop.permute.xlu1 %85  }
  0x8d   :  { %82 = vst.msk [vmem:[#allocation0] sm:$0x1] %vm81_vm13, %v80_v28  }
  0x8e   :  { %88 = vst.msk [vmem:[#allocation0] sm:$0x1] %vm87_vm14, %v86_v29  }
  0x90   :  { %v92_v30 = vpop.permute.xlu0 %91  }
  0x91   :  { %94 = vst.msk [vmem:[#allocation0] sm:$0x1] %vm93_vm15, %v92_v30  }
  0x98   :  { %v98_v31 = vld [vmem:[#allocation0] sm:$0x1] }
  0x99   :  { %100 = vst [vmem:[%s208_s1] sm:$0x1] %v98_v31 }

// kernel: down_coxvd_forward.1
= control target key start
LH: loop header
LB: loop body
LE: loop exit
PB: predicated region body
PF: predicated region fallthrough
CT: control target
= control target key end

     0   :  { %s1984_s27 = smov 0   ;;  %s2308_s0 = inlined_call_operand.vmem [shape: bf16[2,16,64], index: 0, kind: input, shape index: {}]   ;;  %s2309_s1 = inlined_call_operand.vmem [shape: bf16[3,64,128], index: 1, kind: input, shape index: {}]   ;;  %s2310_s2 = inlined_call_operand.vmem [shape: bf16[3,128,128], index: 2, kind: input, shape index: {}]   ;;  %s2311_s3 = inlined_call_operand.vmem [shape: bf16[3,128,128], index: 3, kind: input, shape index: {}]   ;;  %s2312_s4 = inlined_call_operand.vmem [shape: f32[1,128], index: 4, kind: input, shape index: {}]   ;;  %s2313_s5 = inlined_call_operand.vmem [shape: f32[1,128], index: 5, kind: input, shape index: {}]   ;;  %s2314_s6 = inlined_call_operand.vmem [shape: f32[1,128], index: 6, kind: input, shape index: {}]   ;;  %s2315_s7 = inlined_call_operand.vmem [shape: f32[2,16,128], index: 7, kind: output, shape index: {0}]   ;;  %s2316_s8 = inlined_call_operand.vmem [shape: f32[2,8,64], index: 8, kind: output, shape index: {1}]  }
   0x1 LB: > { %s1456_s28 = sadd.s32 4294967295, %s1928_s27   ;;  %p1460_p0 = scmp.ge.s32.totalorder %s1928_s27, 1  ;;  %s1928_s27 = sphi %s1984_s27, %s19_s27  }
   0x2   : > { %p265_p1 = scmp.lt.s32.totalorder %s1928_s27, 3 }
   0x4   : > { %p266_p2 = pnand %p1460_p0, %p265_p1 }
   0x5   : > { %v1862_v0 = vld [vmem:[%s2309_s1 + $0x20] sm:$0xff] (!%p266_p2)   ;;  %v1930_v1 = vmov (!%p266_p2), 0.0   ;;  %v1864_v3 = vld [vmem:[%s2309_s1 + $0x28] sm:$0xff] (!%p266_p2)   ;;  %vm1931_vm0 = vmmov (!%p266_p2), 0   ;;  %p303_p3 = scmp.lt.s32.totalorder (!%p266_p2), %s1456_s28, 1  ;;  %vm318_vm1 = vcmask (!%p266_p2), 516096  }
   0x6   : > { %269 = sbr.rel (%p266_p2) target bundleno = 1033 (0x409), region = 48  ;;  %1689 = vmatprep.subr.bf16.mxu0 (!%p266_p2), %v1930_v1  ;;  %328 = vst [vmem:[#allocation3] sm:$0x1] (!%p266_p2), %v1930_v1  ;;  %329 = vst [vmem:[#allocation3 + $0x11] sm:$0x1] (!%p266_p2), %v1930_v1  ;;  %1701 = vmatprep.subr.bf16.mxu1 (!%p266_p2), %v1930_v1  ;;  %v1863_v2 = vld [vmem:[%s2309_s1] sm:$0xff] (!%p266_p2)  }
   0x7   : > { %1690 = vmatpush3.bf16.msra.mxu0 (!%p266_p2), %v1862_v0  ;;  %1697 = vmatprep.mubr.msk.bf16.mxu0 (!%p266_p2), %vm1931_vm0, %v1930_v1  ;;  %v1865_v4 = vld [vmem:[%s2309_s1 + $0x8] sm:$0xff] (!%p266_p2)   ;;  %v1866_v5 = vld [vmem:[%s2309_s1 + $0x30] sm:$0xff] (!%p266_p2)   ;;  %319 = vst.msk [vmem:[#allocation2] sm:$0x1] (!%p266_p2), %vm318_vm1, %v1930_v1  ;;  %320 = vst.msk [vmem:[#allocation2 + $0x11] sm:$0x1] (!%p266_p2), %vm318_vm1, %v1930_v1 }
   0x8   : > { %1702 = vmatpush3.bf16.msra.mxu1 (!%p266_p2), %v1863_v2  ;;  %1691 = vmatprep.subr.bf16.mxu0 (!%p266_p2), %v1930_v1  ;;  %v1867_v6 = vld [vmem:[%s2309_s1 + $0x10] sm:$0xff] (!%p266_p2)   ;;  %vm325_vm2 = vcmask (!%p266_p2), 523264   ;;  %v1868_v10 = vld [vmem:[%s2309_s1 + $0x38] sm:$0xff] (!%p266_p2)   ;;  %v1870_v12 = vld [vmem:[%s2309_s1 + $0x40] sm:$0xff] (!%p266_p2)   ;;  %s1932_s29 = smov (!%p266_p2), 120   ;;  %s1933_s30 = smov (!%p266_p2), 104  }
   0x9   : > { %1703 = vmatprep.subr.bf16.mxu1 (!%p266_p2), %v1930_v1  ;;  %1709 = vmatprep.mubr.msk.bf16.mxu1 (!%p266_p2), %vm1931_vm0, %v1930_v1  ;;  %v1869_v11 = vld [vmem:[%s2309_s1 + $0x18] sm:$0xff] (!%p266_p2)   ;;  %v1871_v19 = vld [vmem:[%s2309_s1 + $0x48] sm:$0xff] (!%p266_p2)   ;;  %v1872_v20 = vld [vmem:[%s2309_s1 + $0x50] sm:$0xff] (!%p266_p2)   ;;  %s1934_s9 = smov (!%p266_p2), 112   ;;  %s1935_s13 = smov (!%p266_p2), 96   ;;  %vm1284_vm3 = vcmask (!%p266_p2), 64512  }
   0xa   : > { %v1873_v21 = vld [vmem:[%s2309_s1 + $0x58] sm:$0xff] (!%p266_p2)   ;;  %v1874_v25 = vld [vmem:[%s2310_s2 + $0x40] sm:$0xff] (!%p266_p2)   ;;  %v1876_v26 = vld [vmem:[%s2310_s2 + $0x48] sm:$0xff] (!%p266_p2)   ;;  %s1936_s14 = smov (!%p266_p2), 88   ;;  %vm1296_vm4 = vcmask (!%p266_p2), 130112   ;;  %vm1308_vm5 = vcmask (!%p266_p2), 195712  }
   0xb   : > { %1692 = vmatpush3.bf16.msra.mxu0 (!%p266_p2), %v1864_v3  ;;  %v1878_v27 = vld [vmem:[%s2310_s2 + $0x50] sm:$0xff] (!%p266_p2)   ;;  %v1875_v28 = vld [vmem:[%s2310_s2] sm:$0xff] (!%p266_p2)   ;;  %v1877_v29 = vld [vmem:[%s2310_s2 + $0x8] sm:$0xff] (!%p266_p2)   ;;  %vm1320_vm6 = vcmask (!%p266_p2), 261312   ;;  %vm1332_vm7 = vcmask (!%p266_p2), 326912   ;;  %vm1344_vm8 = vcmask (!%p266_p2), 392512  }
   0xc   : > { %1704 = vmatpush3.bf16.msra.mxu1 (!%p266_p2), %v1865_v4  ;;  %1693 = vmatprep.subr.bf16.mxu0 (!%p266_p2), %v1930_v1  ;;  %v1880_v30 = vld [vmem:[%s2310_s2 + $0x58] sm:$0xff] (!%p266_p2)   ;;  %v1879_v31 = vld [vmem:[%s2310_s2 + $0x10] sm:$0xff] (!%p266_p2)   ;;  %v1882_v32 = vld [vmem:[%s2310_s2 + $0x60] sm:$0xff] (!%p266_p2)   ;;  %vm1356_vm9 = vcmask (!%p266_p2), 458112   ;;  %vm1368_vm10 = vcmask (!%p266_p2), 523712  }
   0xd   : > { %s2318_s28 = smov (!%p303_p3, %s1456_s28), 1  ;;  %1705 = vmatprep.subr.bf16.mxu1 %v1930_v1  ;;  %v1884_v33 = vld [vmem:[%s2310_s2 + $0x68] sm:$0xff]   ;;  %v1881_v34 = vld [vmem:[%s2310_s2 + $0x18] sm:$0xff]   ;;  %v1886_v35 = vld [vmem:[%s2310_s2 + $0x70] sm:$0xff]  }
   0xe   : > { %s1614_s17 = sshll.u32 %s2318_s28, 3  ;;  %v1883_v36 = vld [vmem:[%s2310_s2 + $0x20] sm:$0xff]   ;;  %v1888_v37 = vld [vmem:[%s2310_s2 + $0x78] sm:$0xff]   ;;  %v1885_v38 = vld [vmem:[%s2310_s2 + $0x28] sm:$0xff]   ;;  %s1615_s23 = sshll.u32 %s2318_s28, 4 }
   0xf   : > { %s307_s22 = scalar_lea.vmem %s2308_s0, %s1614_s17  ;;  %1694 = vmatpush3.bf16.msra.mxu0 %v1866_v5  ;;  %v1887_v39 = vld [vmem:[%s2310_s2 + $0x30] sm:$0xff]   ;;  %v1889_v40 = vld [vmem:[%s2310_s2 + $0x38] sm:$0xff]   ;;  %v1497_v52 = vld [vmem:[%s2312_s4] ss:$0 sm:$0xff]  ;;  %s312_s26 = scalar_lea.vmem %s2315_s7, %s1615_s23 }
  0x10   : > { %v1617_v7 = vld [vmem:[%s307_s22] sm:$0xff]   ;;  %1706 = vmatpush3.bf16.msra.mxu1 %v1867_v6  ;;  %1695 = vmatprep.subr.bf16.mxu0 %v1930_v1  ;;  %v1891_v0 = vld [vmem:[%s2310_s2 + $0x88] sm:$0xff]   ;;  %v1892_v4 = vld [vmem:[%s2310_s2 + $0x90] sm:$0xff]   ;;  %s2295_s12 = scalar_lea.vmem %s2316_s8, %s1614_s17  ;;  %s1937_s28 = smov 80  }
  0x11   : > { %v1618_v8 = vunpack.c.l.bf16 %v1617_v7  ;;  %v1619_v9 = vunpack.c.h.bf16 %v1617_v7  ;;  %1707 = vmatprep.subr.bf16.mxu1 %v1930_v1  ;;  %v1890_v62 = vld [vmem:[%s2310_s2 + $0x80] sm:$0xff]   ;;  %v1893_v6 = vld [vmem:[%s2310_s2 + $0x98] sm:$0xff]   ;;  %s1938_s17 = smov 72  }
  0x12   : > { %v1894_v7 = vld [vmem:[%s2310_s2 + $0xa0] sm:$0xff]  }
  0x13   : > { %326 = vst.msk [vmem:[#allocation2 + $0x1] sm:$0xff] %vm325_vm2, %v1618_v8  ;;  %327 = vst.msk [vmem:[#allocation2 + $0x9] sm:$0xff] %vm325_vm2, %v1619_v9  ;;  %1696 = vmatpush3.bf16.msra.mxu0 %v1868_v10  ;;  %v1895_v8 = vld [vmem:[%s2310_s2 + $0xa8] sm:$0xff]   ;;  %v1896_v9 = vld [vmem:[%s2310_s2 + $0xb0] sm:$0xff]  }
  0x14   : > { %1708 = vmatpush3.bf16.msra.mxu1 %v1869_v11  ;;  %1713 = vmatprep.subr.bf16.mxu0 %v1930_v1  ;;  %v1897_v10 = vld [vmem:[%s2310_s2 + $0xb8] sm:$0xff]  }
  0x15   : > { %1725 = vmatprep.subr.bf16.mxu1 %v1930_v1 }
  0x1a   : > { %v341_v13 = vld [vmem:[#allocation2 + $0x1] sm:$0xff]  ;;  %v342_v14 = vld [vmem:[#allocation2 + $0x9] sm:$0xff] }
  0x1b   : > { %v330_v15 = vld [vmem:[#allocation2] sm:$0xff]  ;;  %v343_v16 = vpack.c.bf16 %v342_v14, %v341_v13  ;;  %v331_v17 = vld [vmem:[#allocation2 + $0x8] sm:$0xff] }
  0x1c   : > { %v332_v18 = vpack.c.bf16 %v331_v17, %v330_v15  ;;  %v489_v22 = vld [vmem:[#allocation2 + $0x2] sm:$0xff]  ;;  %v490_v23 = vld [vmem:[#allocation2 + $0xa] sm:$0xff] }
  0x1d   : > { %1698 = vmatmul.mubr.msk.bf16.vlgmr.msra.gmra.mrb[0].mxu0 %vm325_vm2, %v343_v16  ;;  %v491_v24 = vpack.c.bf16 %v490_v23, %v489_v22  ;;  %v1898_v14 = vld [vmem:[%s2311_s3 + $0x40] sm:$0xff]   ;;  %v1900_v16 = vld [vmem:[%s2311_s3 + $0x48] sm:$0xff]   ;;  %v1905_v23 = vld [vmem:[%s2311_s3 + $0x18] sm:$0xff]  }
  0x1e   : > { %1710 = vmatmul.mubr.msk.bf16.vlgmr.msra.gmra.mrb[0].mxu1 %vm325_vm2, %v332_v18  ;;  %1714 = vmatpush3.bf16.msra.mxu0 %v1870_v12  ;;  %v1899_v15 = vld [vmem:[%s2311_s3] sm:$0xff]   ;;  %v1901_v17 = vld [vmem:[%s2311_s3 + $0x8] sm:$0xff]   ;;  %v1902_v18 = vld [vmem:[%s2311_s3 + $0x50] sm:$0xff]  }
  0x1f   : > { %1715 = vmatprep.subr.bf16.mxu0 %v1930_v1  ;;  %1721 = vmatprep.mubr.msk.bf16.mxu0 %vm1931_vm0, %v1930_v1  ;;  %v1908_v22 = vld [vmem:[%s2311_s3 + $0x68] sm:$0xff]  }
  0x20   : > { %1741 = vmatprep.mubr.msk.bf16.mxu1 %vm1931_vm0, %v1930_v1  ;;  %1726 = vmatpush3.bf16.msra.mxu1 %v1874_v25  ;;  %v1907_v25 = vld [vmem:[%s2311_s3 + $0x20] sm:$0xff]  }
  0x21   : > { %1727 = vmatprep.subr.bf16.mxu1 %v1930_v1 }
  0x22   : > { %1716 = vmatpush3.bf16.msra.mxu0 %v1871_v19  ;;  %v1903_v19 = vld [vmem:[%s2311_s3 + $0x10] sm:$0xff]  }
  0x23   : > { %1717 = vmatprep.subr.bf16.mxu0 %v1930_v1 }
  0x24   : > { %1728 = vmatpush3.bf16.msra.mxu1 %v1876_v26  ;;  %v1912_v26 = vld [vmem:[%s2311_s3 + $0x78] sm:$0xff]  }
  0x25   : > { %1729 = vmatprep.subr.bf16.mxu1 %v1930_v1 }
  0x26   : > { %1718 = vmatpush3.bf16.msra.mxu0 %v1872_v20  ;;  %v1904_v20 = vld [vmem:[%s2311_s3 + $0x58] sm:$0xff]  }
  0x27   : > { %1719 = vmatprep.subr.bf16.mxu0 %v1930_v1 }
  0x28   : > { %1730 = vmatpush3.bf16.msra.mxu1 %v1878_v27  ;;  %v1909_v27 = vld [vmem:[%s2311_s3 + $0x28] sm:$0xff]  }
  0x29   : > { %1731 = vmatprep.subr.bf16.mxu1 %v1930_v1 }
  0x2a   : > { %1720 = vmatpush3.bf16.msra.mxu0 %v1873_v21  ;;  %v1906_v21 = vld [vmem:[%s2311_s3 + $0x60] sm:$0xff]  }
  0x2b   : > { %1745 = vmatprep.subr.bf16.mxu0 %v1930_v1 }
  0x2c   : > { %1732 = vmatpush3.bf16.msra.mxu1 %v1880_v30 }
  0x2d   : > { %1722 = vmatmul.mubr.msk.bf16.vlgmr.msra.gmra.mrb[4].mxu0 %vm325_vm2, %v491_v24  ;;  %1733 = vmatprep.subr.bf16.mxu1 %v1930_v1  ;;  %v1910_v24 = vld [vmem:[%s2311_s3 + $0x70] sm:$0xff]  }
  0x2e   : > { %1761 = vmatprep.mubr.msk.bf16.mxu0 %vm1931_vm0, %v1930_v1  ;;  %1746 = vmatpush3.bf16.msra.mxu0 %v1875_v28  ;;  %v1911_v28 = vld [vmem:[%s2311_s3 + $0x30] sm:$0xff]  }
  0x2f   : > { %1747 = vmatprep.subr.bf16.mxu0 %v1930_v1 }
  0x30   : > { %1734 = vmatpush3.bf16.msra.mxu1 %v1882_v32 }
  0x31   : > { %1735 = vmatprep.subr.bf16.mxu1 %v1930_v1 }
  0x32   : > { %1748 = vmatpush3.bf16.msra.mxu0 %v1877_v29  ;;  %v1913_v29 = vld [vmem:[%s2311_s3 + $0x38] sm:$0xff]  }
  0x33   : > { %1749 = vmatprep.subr.bf16.mxu0 %v1930_v1 }
  0x34   : > { %1736 = vmatpush3.bf16.msra.mxu1 %v1884_v33 }
  0x35   : > { %1737 = vmatprep.subr.bf16.mxu1 %v1930_v1 }
  0x36   : > { %1750 = vmatpush3.bf16.msra.mxu0 %v1879_v31 }
  0x37   : > { %1751 = vmatprep.subr.bf16.mxu0 %v1930_v1 }
  0x38   : > { %1738 = vmatpush3.bf16.msra.mxu1 %v1886_v35 }
  0x39   : > { %1739 = vmatprep.subr.bf16.mxu1 %v1930_v1 }
  0x3a   : > { %1752 = vmatpush3.bf16.msra.mxu0 %v1881_v34 }
  0x3b   : > { %1753 = vmatprep.subr.bf16.mxu0 %v1930_v1 }
  0x3c   : > { %1740 = vmatpush3.bf16.msra.mxu1 %v1888_v37 }
  0x3d   : > { %1765 = vmatprep.subr.bf16.mxu1 %v1930_v1 }
  0x3e   : > { %1754 = vmatpush3.bf16.msra.mxu0 %v1883_v36 }
  0x3f   : > { %1755 = vmatprep.subr.bf16.mxu0 %v1930_v1 }
  0x42   : > { %1756 = vmatpush3.bf16.msra.mxu0 %v1885_v38 }
  0x43   : > { %1757 = vmatprep.subr.bf16.mxu0 %v1930_v1 }
  0x46   : > { %1758 = vmatpush3.bf16.msra.mxu0 %v1887_v39 }
  0x47   : > { %1759 = vmatprep.subr.bf16.mxu0 %v1930_v1 }
  0x4a   : > { %1760 = vmatpush3.bf16.msra.mxu0 %v1889_v40 }
  0x4b   : > { %1785 = vmatprep.subr.bf16.mxu0 %v1930_v1 }
  0xf0   : > { %v414_v41 = vpop.f32.mrb[0].mxu0 }
  0xf1   : > { %v482_v42 = vpop.f32.mrb[0].mxu1  ;;  %v1699_v43 = vpop.f32.mrb[1].mxu0 }
  0xf2   : > { %v483_v44 = vadd.f32 %v482_v42, %v414_v41  ;;  %v1711_v45 = vpop.f32.mrb[1].mxu1  ;;  %v417_v46 = vpop.f32.mrb[2].mxu0  ;;  %v1554_v41 = vld [vmem:[%s2313_s5] ss:$0 sm:$0xff] }
  0xf3   : > { %v485_v47 = vpop.f32.mrb[2].mxu1  ;;  %v1700_v48 = vpop.f32.mrb[3].mxu0 }
  0xf4   : > { %v486_v49 = vadd.f32 %v485_v47, %v417_v46  ;;  %v1712_v50 = vpop.f32.mrb[3].mxu1 }
 0x100   : > { %v562_v51 = vpop.f32.mrb[4].mxu0 }
 0x101   : > { %v569_v53 = vadd.f32 %v562_v51, %v483_v44  ;;  %v1723_v54 = vpop.f32.mrb[5].mxu0 }
 0x102   : > { %v565_v55 = vpop.f32.mrb[6].mxu0 }
 0x103   : > { %v578_v56 = vadd.f32 %v1497_v52, %v569_v53  ;;  %v570_v57 = vadd.f32 %v565_v55, %v486_v49  ;;  %v1724_v58 = vpop.f32.mrb[7].mxu0  ;;  %v1914_v53 = vld [vmem:[%s2311_s3 + $0x80] sm:$0xff]   ;;  %v1915_v55 = vld [vmem:[%s2311_s3 + $0x88] sm:$0xff]  }
 0x104   : > { %v1916_v58 = vld [vmem:[%s2311_s3 + $0x90] sm:$0xff]  }
 0x105   : > { %v2136_v59 = vmax.f32 %v578_v56, 0.0  ;;  %v579_v60 = vadd.f32 %v1497_v52, %v570_v57 }
 0x107   : > { %582 = vst [vmem:[#allocation3 + $0x1] sm:$0xff] %v2136_v59  ;;  %v2139_v61 = vmax.f32 %v579_v60, 0.0  ;;  %v1917_v60 = vld [vmem:[%s2311_s3 + $0x98] sm:$0xff]  }
 0x109   : > { %583 = vst [vmem:[#allocation3 + $0x9] sm:$0xff] %v2139_v61  ;;  %v605_v63 = vpack.c.bf16 %v2139_v61, %v2136_v59 }
 0x10b   : > { %1742 = vmatmul.mubr.bf16.vlgmr.msra.gmra.mrb[4].mxu1 %v605_v63  ;;  %v1920_v63 = vld [vmem:[%s2311_s3 + $0xb0] sm:$0xff]  }
 0x10c   : > { %1766 = vmatpush3.bf16.msra.mxu1 %v1890_v62  ;;  %1781 = vmatprep.mubr.msk.bf16.mxu1 %vm1931_vm0, %v1930_v1  ;;  %v1919_v62 = vld [vmem:[%s2311_s3 + $0xa8] sm:$0xff]  }
 0x10d   : > { %1767 = vmatprep.subr.bf16.mxu1 %v1930_v1 }
 0x10e   : > { %v584_v2 = vld [vmem:[#allocation3] sm:$0xff] }
 0x110   : > { %v585_v3 = vld [vmem:[#allocation3 + $0x8] sm:$0xff]  ;;  %1768 = vmatpush3.bf16.msra.mxu1 %v1891_v0  ;;  %v1921_v0 = vld [vmem:[%s2311_s3 + $0xb8] sm:$0xff]  }
 0x111   : > { %v586_v5 = vpack.c.bf16 %v585_v3, %v584_v2  ;;  %1769 = vmatprep.subr.bf16.mxu1 %v1930_v1  ;;  %v801_v11 = vld [vmem:[#allocation3 + $0x2] sm:$0xff]  ;;  %v802_v12 = vld [vmem:[#allocation3 + $0xa] sm:$0xff] }
 0x112   : > { %v803_v13 = vpack.c.bf16 %v802_v12, %v801_v11 }
 0x113   : > { %1762 = vmatmul.mubr.bf16.vlgmr.msra.gmra.mrb[8].mxu0 %v586_v5 }
 0x114   : > { %1770 = vmatpush3.bf16.msra.mxu1 %v1892_v4  ;;  %1801 = vmatprep.mubr.msk.bf16.mxu0 %vm1931_vm0, %v1930_v1 }
 0x115   : > { %1771 = vmatprep.subr.bf16.mxu1 %v1930_v1  ;;  %1786 = vmatpush3.bf16.msra.mxu0 %v1898_v14 }
 0x116   : > { %1787 = vmatprep.subr.bf16.mxu0 %v1930_v1 }
 0x118   : > { %1772 = vmatpush3.bf16.msra.mxu1 %v1893_v6 }
 0x119   : > { %1773 = vmatprep.subr.bf16.mxu1 %v1930_v1  ;;  %1788 = vmatpush3.bf16.msra.mxu0 %v1900_v16 }
 0x11a   : > { %1789 = vmatprep.subr.bf16.mxu0 %v1930_v1 }
 0x11c   : > { %1774 = vmatpush3.bf16.msra.mxu1 %v1894_v7 }
 0x11d   : > { %1775 = vmatprep.subr.bf16.mxu1 %v1930_v1  ;;  %1790 = vmatpush3.bf16.msra.mxu0 %v1902_v18 }
 0x11e   : > { %1791 = vmatprep.subr.bf16.mxu0 %v1930_v1 }
 0x120   : > { %1776 = vmatpush3.bf16.msra.mxu1 %v1895_v8 }
 0x121   : > { %1777 = vmatprep.subr.bf16.mxu1 %v1930_v1  ;;  %1792 = vmatpush3.bf16.msra.mxu0 %v1904_v20 }
 0x122   : > { %1793 = vmatprep.subr.bf16.mxu0 %v1930_v1 }
 0x124   : > { %1778 = vmatpush3.bf16.msra.mxu1 %v1896_v9 }
 0x125   : > { %1779 = vmatprep.subr.bf16.mxu1 %v1930_v1  ;;  %1794 = vmatpush3.bf16.msra.mxu0 %v1906_v21 }
 0x126   : > { %1795 = vmatprep.subr.bf16.mxu0 %v1930_v1 }
 0x128   : > { %1780 = vmatpush3.bf16.msra.mxu1 %v1897_v10 }
 0x129   : > { %1805 = vmatprep.subr.bf16.mxu1 %v1930_v1  ;;  %1796 = vmatpush3.bf16.msra.mxu0 %v1908_v22 }
 0x12a   : > { %1797 = vmatprep.subr.bf16.mxu0 %v1930_v1 }
 0x12b   : > { %1782 = vmatmul.mubr.bf16.vlgmr.msra.gmra.mrb[8].mxu1 %v803_v13 }
 0x12c   : > { %1821 = vmatprep.mubr.msk.bf16.mxu1 %vm1931_vm0, %v1930_v1  ;;  %1806 = vmatpush3.bf16.msra.mxu1 %v1899_v15 }
 0x12d   : > { %1807 = vmatprep.subr.bf16.mxu1 %v1930_v1  ;;  %1798 = vmatpush3.bf16.msra.mxu0 %v1910_v24 }
 0x12e   : > { %1799 = vmatprep.subr.bf16.mxu0 %v1930_v1 }
 0x130   : > { %1808 = vmatpush3.bf16.msra.mxu1 %v1901_v17 }
 0x131   : > { %1809 = vmatprep.subr.bf16.mxu1 %v1930_v1  ;;  %1800 = vmatpush3.bf16.msra.mxu0 %v1912_v26 }
 0x132   : > { %1825 = vmatprep.subr.bf16.mxu0 %v1930_v1 }
 0x134   : > { %1810 = vmatpush3.bf16.msra.mxu1 %v1903_v19 }
 0x135   : > { %1811 = vmatprep.subr.bf16.mxu1 %v1930_v1 }
 0x138   : > { %1812 = vmatpush3.bf16.msra.mxu1 %v1905_v23 }
 0x139   : > { %1813 = vmatprep.subr.bf16.mxu1 %v1930_v1 }
 0x13c   : > { %1814 = vmatpush3.bf16.msra.mxu1 %v1907_v25 }
 0x13d   : > { %1815 = vmatprep.subr.bf16.mxu1 %v1930_v1 }
 0x140   : > { %1816 = vmatpush3.bf16.msra.mxu1 %v1909_v27 }
 0x141   : > { %1817 = vmatprep.subr.bf16.mxu1 %v1930_v1 }
 0x144   : > { %1818 = vmatpush3.bf16.msra.mxu1 %v1911_v28 }
 0x145   : > { %1819 = vmatprep.subr.bf16.mxu1 %v1930_v1 }
 0x148   : > { %1820 = vmatpush3.bf16.msra.mxu1 %v1913_v29 }
 0x1de   : > { %v705_v30 = vpop.f32.mrb[4].mxu1 }
 0x1df   : > { %v1743_v31 = vpop.f32.mrb[5].mxu1 }
 0x1e0   : > { %v708_v32 = vpop.f32.mrb[6].mxu1 }
 0x1e1   : > { %v1744_v33 = vpop.f32.mrb[7].mxu1 }
 0x1e6   : > { %v794_v34 = vpop.f32.mrb[8].mxu0 }
 0x1e7   : > { %v795_v35 = vadd.f32 %v794_v34, %v705_v30  ;;  %v1763_v36 = vpop.f32.mrb[9].mxu0 }
 0x1e8   : > { %v797_v37 = vpop.f32.mrb[10].mxu0 }
 0x1e9   : > { %v798_v38 = vadd.f32 %v797_v37, %v708_v32  ;;  %v1764_v39 = vpop.f32.mrb[11].mxu0 }
 0x1fe   : > { %v903_v40 = vpop.f32.mrb[8].mxu1 }
 0x1ff   : > { %v910_v42 = vadd.f32 %v903_v40, %v795_v35  ;;  %v1783_v43 = vpop.f32.mrb[9].mxu1 }
 0x200   : > { %v906_v44 = vpop.f32.mrb[10].mxu1 }
 0x201   : > { %v919_v45 = vadd.f32 %v1554_v41, %v910_v42  ;;  %v911_v46 = vadd.f32 %v906_v44, %v798_v38  ;;  %v1784_v47 = vpop.f32.mrb[11].mxu1 }
 0x203   : > { %v921_v48 = vadd.f32 %v919_v45, %v2136_v59  ;;  %v920_v49 = vadd.f32 %v1554_v41, %v911_v46 }
 0x205   : > { %v923_v50 = vmax.f32 %v921_v48, 0.0  ;;  %v922_v51 = vadd.f32 %v920_v49, %v2139_v61  ;;  %v1918_v61 = vld [vmem:[%s2311_s3 + $0xa0] sm:$0xff]  }
 0x207   : > { %925 = vst [vmem:[#allocation3 + $0x1] sm:$0xff] %v923_v50  ;;  %v924_v52 = vmax.f32 %v922_v51, 0.0 }
 0x209   : > { %926 = vst [vmem:[#allocation3 + $0x9] sm:$0xff] %v924_v52  ;;  %v948_v54 = vpack.c.bf16 %v924_v52, %v923_v50 }
 0x20b   : > { %1802 = vmatmul.mubr.bf16.vlgmr.msra.gmra.mrb[12].mxu0 %v948_v54 }
 0x20c   : > { %1826 = vmatpush3.bf16.msra.mxu0 %v1914_v53  ;;  %1841 = vmatprep.mubr.msk.bf16.mxu0 %vm1931_vm0, %v1930_v1 }
 0x20d   : > { %1827 = vmatprep.subr.bf16.mxu0 %v1930_v1 }
 0x20e   : > { %v927_v56 = vld [vmem:[#allocation3] sm:$0xff] }
 0x210   : > { %v928_v57 = vld [vmem:[#allocation3 + $0x8] sm:$0xff]  ;;  %1828 = vmatpush3.bf16.msra.mxu0 %v1915_v55 }
 0x211   : > { %v929_v59 = vpack.c.bf16 %v928_v57, %v927_v56  ;;  %1829 = vmatprep.subr.bf16.mxu0 %v1930_v1  ;;  %v1144_v2 = vld [vmem:[#allocation3 + $0x2] sm:$0xff]  ;;  %v1145_v3 = vld [vmem:[#allocation3 + $0xa] sm:$0xff] }
 0x212   : > { %v1146_v4 = vpack.c.bf16 %v1145_v3, %v1144_v2 }
 0x213   : > { %1822 = vmatmul.mubr.bf16.vlgmr.msra.gmra.mrb[12].mxu1 %v929_v59 }
 0x214   : > { %1830 = vmatpush3.bf16.msra.mxu0 %v1916_v58 }
 0x215   : > { %1831 = vmatprep.subr.bf16.mxu0 %v1930_v1 }
 0x218   : > { %1832 = vmatpush3.bf16.msra.mxu0 %v1917_v60 }
 0x219   : > { %1833 = vmatprep.subr.bf16.mxu0 %v1930_v1 }
 0x21c   : > { %1834 = vmatpush3.bf16.msra.mxu0 %v1918_v61 }
 0x21d   : > { %1835 = vmatprep.subr.bf16.mxu0 %v1930_v1 }
 0x220   : > { %1836 = vmatpush3.bf16.msra.mxu0 %v1919_v62 }
 0x221   : > { %1837 = vmatprep.subr.bf16.mxu0 %v1930_v1 }
 0x224   : > { %1838 = vmatpush3.bf16.msra.mxu0 %v1920_v63 }
 0x225   : > { %1839 = vmatprep.subr.bf16.mxu0 %v1930_v1  ;;  %v1611_v1 = vld [vmem:[%s2314_s6] ss:$0 sm:$0xff] }
 0x228   : > { %1840 = vmatpush3.bf16.msra.mxu0 %v1921_v0 }
 0x22b   : > { %1842 = vmatmul.mubr.bf16.vlgmr.msra.gmra.mrb[16].mxu0 %v1146_v4 }
 0x2de   : > { %v1048_v5 = vpop.f32.mrb[12].mxu0 }
 0x2df   : > { %v1803_v6 = vpop.f32.mrb[13].mxu0 }
 0x2e0   : > { %v1051_v7 = vpop.f32.mrb[14].mxu0 }
 0x2e1   : > { %v1804_v8 = vpop.f32.mrb[15].mxu0 }
 0x2e6   : > { %v1137_v9 = vpop.f32.mrb[12].mxu1 }
 0x2e7   : > { %v1138_v10 = vadd.f32 %v1137_v9, %v1048_v5  ;;  %v1823_v11 = vpop.f32.mrb[13].mxu1 }
 0x2e8   : > { %v1140_v12 = vpop.f32.mrb[14].mxu1 }
 0x2e9   : > { %v1141_v13 = vadd.f32 %v1140_v12, %v1051_v7  ;;  %v1824_v14 = vpop.f32.mrb[15].mxu1 }
 0x2fe   : > { %v1246_v15 = vpop.f32.mrb[16].mxu0 }
 0x2ff   : > { %v1253_v16 = vadd.f32 %v1246_v15, %v1138_v10  ;;  %v1843_v17 = vpop.f32.mrb[17].mxu0 }
 0x300   : > { %v1249_v18 = vpop.f32.mrb[18].mxu0 }
 0x301   : > { %v1262_v19 = vadd.f32 %v1611_v1, %v1253_v16  ;;  %v1254_v20 = vadd.f32 %v1249_v18, %v1141_v13  ;;  %v1844_v21 = vpop.f32.mrb[19].mxu0 }
 0x303   : > { %v1264_v22 = vadd.f32 %v1262_v19, %v923_v50  ;;  %v1263_v23 = vadd.f32 %v1611_v1, %v1254_v20 }
 0x305   : > { %v1266_v24 = vmax.f32 %v1264_v22, 0.0  ;;  %v1265_v25 = vadd.f32 %v1263_v23, %v924_v52 }
 0x307   : > { %1268 = vst [vmem:[#allocation3 + $0x1] sm:$0xff] %v1266_v24  ;;  %1270 = vst [vmem:[%s312_s26] sm:$0xff] %v1266_v24  ;;  %v1267_v26 = vmax.f32 %v1265_v25, 0.0 }
 0x309   : > { %1269 = vst [vmem:[#allocation3 + $0x9] sm:$0xff] %v1267_v26  ;;  %1271 = vst [vmem:[%s312_s26 + $0x8] sm:$0xff] %v1267_v26 }
 0x310   : > { %v1273_v27 = vld [vmem:[#allocation3 + $0x1] ss:$2 sm:$0xff]  ;;  %v1275_v28 = vld [vmem:[#allocation3 + $0x2] ss:$2 sm:$0xff] }
 0x311   : > { %v1276_v29 = vmax.f32 %v1273_v27, %v1275_v28 }
 0x313   : > { %1312 = vrot.lane.b32.xlu1 %v1276_v29, %s1932_s29  ;;  %1288 = vrot.lane.b32.xlu0 %v1276_v29, %s1932_s29 }
 0x317   : > { %1324 = vrot.lane.b32.xlu1 %v1276_v29, %s1932_s29  ;;  %1300 = vrot.lane.b32.xlu0 %v1276_v29, %s1932_s29 }
 0x31b   : > { %1348 = vrot.lane.b32.xlu1 %v1276_v29, %s1932_s29  ;;  %1336 = vrot.lane.b32.xlu0 %v1276_v29, %s1932_s29 }
 0x31f   : > { %1280 = vrot.lane.b32.xlu1 %v1276_v29, %s1932_s29  ;;  %1360 = vrot.lane.b32.xlu0 %v1276_v29, %s1932_s29 }
 0x385   : > { %v1313_v30 = vpop.permute.xlu1 %1312  ;;  %v1289_v31 = vpop.permute.xlu0 %1288 }
 0x386   : > { %v1291_v32 = vmax.f32 %v1276_v29, %v1289_v31  ;;  %v1315_v35 = vmax.f32 %v1276_v29, %v1313_v30 }
 0x388   : > { %1293 = vrot.lane.b32.xlu0 %v1291_v32, %s1932_s29 }
 0x389   : > { %v1325_v33 = vpop.permute.xlu1 %1324  ;;  %v1301_v34 = vpop.permute.xlu0 %1300 }
 0x38a   : > { %v1303_v36 = vmax.f32 %v1276_v29, %v1301_v34  ;;  %v1327_v39 = vmax.f32 %v1276_v29, %v1325_v33 }
 0x38c   : > { %1317 = vrot.lane.b32.xlu0 %v1315_v35, %s1933_s30  ;;  %1305 = vrot.lane.b32.xlu1 %v1303_v36, %s1934_s9 }
 0x38d   : > { %v1349_v37 = vpop.permute.xlu1 %1348  ;;  %v1337_v38 = vpop.permute.xlu0 %1336 }
 0x38e   : > { %v1339_v40 = vmax.f32 %v1276_v29, %v1337_v38  ;;  %v1351_v43 = vmax.f32 %v1276_v29, %v1349_v37 }
 0x390   : > { %1329 = vrot.lane.b32.xlu1 %v1327_v39, %s1935_s13  ;;  %1341 = vrot.lane.b32.xlu0 %v1339_v40, %s1936_s14 }
 0x391   : > { %v1281_v41 = vpop.permute.xlu1 %1280  ;;  %v1361_v42 = vpop.permute.xlu0 %1360 }
 0x392   : > { %v1283_v44 = vmax.f32 %v1276_v29, %v1281_v41  ;;  %v1363_v45 = vmax.f32 %v1276_v29, %v1361_v42 }
 0x394   : > { %1285 = vst.msk [vmem:[%s2295_s12] sm:$0xff] %vm1284_vm3, %v1283_v44  ;;  %1353 = vrot.lane.b32.xlu1 %v1351_v43, %s1937_s28  ;;  %1365 = vrot.lane.b32.xlu0 %v1363_v45, %s1938_s17 }
 0x3fa   : > { %v1294_v46 = vpop.permute.xlu0 %1293 }
 0x3fb   : > { %1297 = vst.msk [vmem:[%s2295_s12] sm:$0xff] %vm1296_vm4, %v1294_v46 }
 0x3fe   : > { %v1306_v47 = vpop.permute.xlu1 %1305  ;;  %v1318_v48 = vpop.permute.xlu0 %1317 }
 0x3ff   : > { %1309 = vst.msk [vmem:[%s2295_s12] sm:$0xff] %vm1308_vm5, %v1306_v47 }
 0x400   : > { %1321 = vst.msk [vmem:[%s2295_s12] sm:$0xff] %vm1320_vm6, %v1318_v48 }
 0x402   : > { %v1330_v49 = vpop.permute.xlu1 %1329  ;;  %v1342_v50 = vpop.permute.xlu0 %1341 }
 0x403   : > { %1333 = vst.msk [vmem:[%s2295_s12] sm:$0xff] %vm1332_vm7, %v1330_v49 }
 0x404   : > { %1345 = vst.msk [vmem:[%s2295_s12] sm:$0xff] %vm1344_vm8, %v1342_v50 }
 0x406   : > { %v1354_v51 = vpop.permute.xlu1 %1353  ;;  %v1366_v52 = vpop.permute.xlu0 %1365 }
 0x407   : > { %1357 = vst.msk [vmem:[%s2295_s12] sm:$0xff] %vm1356_vm9, %v1354_v51 }
 0x408   : > { %1369 = vst.msk [vmem:[%s2295_s12] sm:$0xff] %vm1368_vm10, %v1366_v52 }
 0x409 PF: > { %s19_s27 = sadd.s32 1, %s1928_s27  }
 0x40a   : > { %p16_p4 = scmp.ge.s32.totalorder %s19_s27, 4  }
 0x40c   :  { %18 = sbr.rel (!%p16_p4) target bundleno = 1 (0x1), region = 98 }

</bundles_post_ra>
